<compile_context>
chip_gen: v5e
topology: v5e:2x2
jax: 0.10.0
libtpu: 0.0.40
codegen_flags: <defaults>
</compile_context>

<pallas_src>
import functools
import math

import jax
import jax.numpy as jnp
from jax.experimental import pallas as pl
from jax.experimental.pallas import tpu as pltpu


_INV_SQRT2 = 1.0 / math.sqrt(2.0)
_LANE = 128
_SUBLANE = 16  # 16-row multiples are sublane-friendly for both f32 and bf16


def _round_up(x, m):
    return (x + m - 1) // m * m


def _round_down(x, m):
    return (x // m) * m


def _dtype_bytes(dt):
    return jnp.dtype(dt).itemsize


def _vmem_capacity_bytes():
    """Physical VMEM of the local TPU generation.  Falls back to the smallest
    production value (v7x: 64 MiB / TensorCore) when the query is unavailable."""
    cap = 64 * 1024 * 1024
    try:
        info = pltpu.get_tpu_info()
        cap = int(getattr(info, "vmem_capacity_bytes", cap) or cap)
    except Exception:
        pass
    return cap


# ---------------------------------------------------------------------------
# Kernels
# ---------------------------------------------------------------------------


def _dot_f32(a, b, cast_bf16):
    """MXU matmul with f32 accumulation; optionally force bf16 operands."""
    if cast_bf16:
        a = a.astype(jnp.bfloat16)
        b = b.astype(jnp.bfloat16)
    elif a.dtype != b.dtype:
        a = a.astype(b.dtype)
    return jnp.dot(a, b, preferred_element_type=jnp.float32)


def _gelu_erf(h):
    # exact erf-based GELU (matches the PyTorch module), f32 VPU math.
    return h * 0.5 * (1.0 + jax.lax.erf(h * _INV_SQRT2))


def _ffn_kernel_fullh(x_ref, w1_ref, b1_ref, w2_ref, b2_ref, o_ref, *, cast_bf16):
    # Weights-resident path: 1-D grid over M, full hidden dim per step.
    h = _dot_f32(x_ref[...], w1_ref[...], cast_bf16)
    h = _gelu_erf(h + b1_ref[...].astype(jnp.float32))
    # dropout -> identity (eval mode).
    out = _dot_f32(h, w2_ref[...], cast_bf16) + b2_ref[...].astype(jnp.float32)
    o_ref[...] = out.astype(o_ref.dtype)


def _ffn_kernel_htiled(x_ref, w1_ref, b1_ref, w2_ref, b2_ref, o_ref, acc_ref, *, cast_bf16):
    # H-tiled path: grid (M tiles, H tiles), f32 accumulator resident over H.
    j = pl.program_id(1)

    @pl.when(j == 0)
    def _():
        acc_ref[...] = jnp.zeros_like(acc_ref)

    h = _dot_f32(x_ref[...], w1_ref[...], cast_bf16)
    h = _gelu_erf(h + b1_ref[...].astype(jnp.float32))
    # dropout -> identity (eval mode).
    acc_ref[...] += _dot_f32(h, w2_ref[...], cast_bf16)

    @pl.when(j == pl.num_programs(1) - 1)
    def _():
        # b2 added exactly once, in the finalize branch.
        o_ref[...] = (acc_ref[...] + b2_ref[...].astype(jnp.float32)).astype(o_ref.dtype)


# ---------------------------------------------------------------------------
# Parameter preparation (done ONCE, not per forward call)
# ---------------------------------------------------------------------------


def prepare_ffn_params(w1_t, b1, w2_t, b2):
    """Pad FFN parameters to lane-aligned (multiple-of-128) shapes once.

    w1_t: (D, H)  (PyTorch fc1.weight transposed), b1: (H,)
    w2_t: (H, D)  (PyTorch fc2.weight transposed), b2: (D,)
    Zero padding is exact: padded rows/cols contribute nothing
    (fc1 pad -> 0, GELU(0) = 0, fc2 pad rows are zero).
    """
    d_in, hidden = w1_t.shape
    assert w2_t.shape == (hidden, d_in)
    d_pad = _round_up(d_in, _LANE)
    h_pad = _round_up(hidden, _LANE)
    w1_p = jnp.zeros((d_pad, h_pad), w1_t.dtype).at[:d_in, :hidden].set(w1_t)
    b1_p = jnp.zeros((1, h_pad), b1.dtype).at[0, :hidden].set(b1)
    w2_p = jnp.zeros((h_pad, d_pad), w2_t.dtype).at[:hidden, :d_in].set(w2_t)
    b2_p = jnp.zeros((1, d_pad), b2.dtype).at[0, :d_in].set(b2)
    return w1_p, b1_p, w2_p, b2_p


# ---------------------------------------------------------------------------
# Tile / VMEM budgeting
# ---------------------------------------------------------------------------


def _choose_tiles(m, d_pad, h_pad, x_bytes, w_bytes, tm_req, th_req, weights_resident):
    cap = _vmem_capacity_bytes()
    budget = int(cap * 0.75)  # headroom for compiler-internal scratch

    # --- hidden-dim tiling: keep full weights VMEM-resident when they fit ---
    full_w = 2 * d_pad * h_pad * w_bytes  # fc1 + fc2 weights
    if weights_resident is None:
        # 2x: conservatively assume double-buffered weight allocation.
        weights_resident = (2 * full_w) <= int(0.6 * budget)
    if weights_resident:
        th = h_pad
    else:
        n128 = h_pad // _LANE
        # Cap th so double-buffered (D, th) + (th, D) weight slices use <= half budget.
        max_th = max(_LANE, int((0.5 * budget) // max(4 * d_pad * w_bytes, 1)))
        target = min(th_req if th_req else 1024, h_pad, max_th)
        best = 1
        for dvs in range(1, n128 + 1):
            if n128 % dvs == 0 and _LANE * dvs <= target:
                best = dvs
        th = _LANE * best  # th divides h_pad: no zero-compute on the last H tile
        weights_resident = (th == h_pad)

    # --- M tiling: as large as VMEM allows (arithmetic intensity ~ tm flops/byte) ---
    if weights_resident:
        w_cost = 2 * full_w
        per_row = d_pad * (2 * x_bytes + 2 * x_bytes) + h_pad * 4  # x dbuf + out dbuf + h temp
    else:
        w_cost = 2 * 2 * d_pad * th * w_bytes
        per_row = d_pad * (2 * x_bytes + 2 * x_bytes + 4) + th * 4  # + f32 accumulator

    rem = max(budget - w_cost, 0)
    m_r = _round_up(m, _SUBLANE)
    tm = tm_req if tm_req else 512
    tm = min(tm, max(_SUBLANE, rem // max(per_row, 1)), m_r)
    # MXU-friendly alignment (v6e/v7x MXU is 2x256x256; v5e is 4x128x128).
    if tm >= 256:
        tm = _round_down(tm, 256)
    elif tm >= 128:
        tm = _round_down(tm, 128)
    else:
        tm = _round_down(tm, _SUBLANE)
    tm = max(_SUBLANE, tm)
    # Megacore: guarantee >=2 tiles along the parallel M axis when enough rows
    # exist (v7x has 2 TensorCores per chip).
    if tm_req is None and m_r >= 2 * _SUBLANE and tm >= m_r:
        tm = _round_up((m_r + 1) // 2, _SUBLANE)
    m_pad = _round_up(m_r, tm)

    # Always pass an explicit scoped-VMEM limit for this configuration.
    est = w_cost + tm * per_row + (4 << 20)
    vmem_limit = int(min(max(est, 32 << 20), int(cap * 0.95)))
    return tm, th, m_pad, weights_resident, vmem_limit


# ---------------------------------------------------------------------------
# Forward pass
# ---------------------------------------------------------------------------


@functools.partial(jax.jit, static_argnames=("tm", "th", "mxu_bf16", "weights_resident"))
def ffn_pallas(x, w1_p, b1_p, w2_p, b2_p, *, tm=None, th=None, mxu_bf16=False,
               weights_resident=None):
    """Fused FFN forward: fc1 -> erf-GELU -> dropout(id) -> fc2 -> dropout(id).

    Parameters must come from `prepare_ffn_params` (padded once at init).
    x: (..., D_in) with D_in <= w1_p.shape[0]; returns same shape/dtype as x.
    """
    orig_shape = x.shape
    d_in = orig_shape[-1]
    d_pad, h_pad = w1_p.shape
    assert w2_p.shape == (h_pad, d_pad) and d_in <= d_pad

    x2d = x.reshape(-1, d_in)
    m = x2d.shape[0]
    x_bytes = _dtype_bytes(x.dtype)
    w_bytes = _dtype_bytes(w1_p.dtype)

    tm_, th_, m_pad, resident, vmem_limit = _choose_tiles(
        m, d_pad, h_pad, x_bytes, w_bytes, tm, th, weights_resident)

    # Pad x only when the (static) shapes require it; zero padding is exact.
    need_pad = (m_pad != m) or (d_pad != d_in)
    if need_pad:
        x_p = jnp.zeros((m_pad, d_pad), x.dtype).at[:m, :d_in].set(x2d)
    else:
        x_p = x2d

    m_tiles = m_pad // tm_

    if resident or th_ == h_pad:
        kernel = functools.partial(_ffn_kernel_fullh, cast_bf16=mxu_bf16)
        grid = (m_tiles,)
        in_specs = [
            pl.BlockSpec((tm_, d_pad), lambda i: (i, 0)),      # x row tile
            pl.BlockSpec((d_pad, h_pad), lambda i: (0, 0)),    # fc1 weight (resident)
            pl.BlockSpec((1, h_pad), lambda i: (0, 0)),        # fc1 bias
            pl.BlockSpec((h_pad, d_pad), lambda i: (0, 0)),    # fc2 weight (resident)
            pl.BlockSpec((1, d_pad), lambda i: (0, 0)),        # fc2 bias
        ]
        out_specs = pl.BlockSpec((tm_, d_pad), lambda i: (i, 0))
        scratch_shapes = []
        dims = ("parallel",)
    else:
        kernel = functools.partial(_ffn_kernel_htiled, cast_bf16=mxu_bf16)
        grid = (m_tiles, h_pad // th_)
        in_specs = [
            pl.BlockSpec((tm_, d_pad), lambda i, j: (i, 0)),   # x row tile
            pl.BlockSpec((d_pad, th_), lambda i, j: (0, j)),   # fc1 weight slice
            pl.BlockSpec((1, th_), lambda i, j: (0, j)),       # fc1 bias slice
            pl.BlockSpec((th_, d_pad), lambda i, j: (j, 0)),   # fc2 weight slice
            pl.BlockSpec((1, d_pad), lambda i, j: (0, 0)),     # fc2 bias
        ]
        out_specs = pl.BlockSpec((tm_, d_pad), lambda i, j: (i, 0))
        scratch_shapes = [pltpu.VMEM((tm_, d_pad), jnp.float32)]
        dims = ("parallel", "arbitrary")

    out_p = pl.pallas_call(
        kernel,
        out_shape=jax.ShapeDtypeStruct((m_pad, d_pad), x.dtype),
        grid_spec=pltpu.PrefetchScalarGridSpec(
            num_scalar_prefetch=0,
            grid=grid,
            in_specs=in_specs,
            out_specs=out_specs,
            scratch_shapes=scratch_shapes,
        ),
        compiler_params=pltpu.CompilerParams(
            dimension_semantics=dims,
            vmem_limit_bytes=vmem_limit,
        ),
    )(x_p, w1_p, b1_p, w2_p, b2_p)

    out = out_p[:m, :d_in] if need_pad else out_p
    return out.reshape(orig_shape)


# ---------------------------------------------------------------------------
# Reference + demo
# ---------------------------------------------------------------------------


def _reference_ffn(x, w1_t, b1, w2_t, b2):
    x32 = x.astype(jnp.float32)
    h = x32 @ w1_t.astype(jnp.float32) + b1.astype(jnp.float32)
    h = h * 0.5 * (1.0 + jax.lax.erf(h / jnp.sqrt(2.0)))
    return h @ w2_t.astype(jnp.float32) + b2.astype(jnp.float32)


def _make_params(key, d_in, hidden, dtype=jnp.float32):
    kw1, kb1, kw2, kb2 = jax.random.split(key, 4)
    bound1 = 1.0 / math.sqrt(d_in)
    bound2 = 1.0 / math.sqrt(hidden)
    # PyTorch fc1.weight is (hidden, d_in); stored pre-transposed as (d_in, hidden).
    w1_t = jax.random.uniform(kw1, (d_in, hidden), dtype, -bound1, bound1)
    b1 = jax.random.uniform(kb1, (hidden,), dtype, -bound1, bound1)
    # PyTorch fc2.weight is (d_in, hidden); stored pre-transposed as (hidden, d_in).
    w2_t = jax.random.uniform(kw2, (hidden, d_in), dtype, -bound2, bound2)
    b2 = jax.random.uniform(kb2, (d_in,), dtype, -bound2, bound2)
    return w1_t, b1, w2_t, b2


if __name__ == "__main__":
    key = jax.random.PRNGKey(0)
    kx1, kp1, kx2, kp2 = jax.random.split(key, 4)

    # --- Case A/B/C: small shapes consistent with the module ---------------
    batch, seq, input_dim, hidden_dim = 2, 8, 32, 64
    x = jax.random.normal(kx1, (batch, seq, input_dim), dtype=jnp.float32)
    w1_t, b1, w2_t, b2 = _make_params(kp1, input_dim, hidden_dim)
    params = prepare_ffn_params(w1_t, b1, w2_t, b2)
    ref = _reference_ffn(x, w1_t, b1, w2_t, b2)

    # A) f32 path, weights-resident kernel (exact erf GELU).
    out = jax.block_until_ready(ffn_pallas(x, *params))
    assert out.shape == x.shape
    assert jnp.allclose(out, ref, atol=1e-4, rtol=1e-4), "f32 mismatch vs reference"

    # B) f32 inputs with in-kernel bf16 MXU operands (fast path) - looser tol.
    out_fast = jax.block_until_ready(ffn_pallas(x, *params, mxu_bf16=True))
    assert jnp.allclose(out_fast, ref, atol=5e-2, rtol=5e-2), "mxu_bf16 mismatch"

    # C) bf16 inputs / weights - looser tolerance.
    params_bf16 = prepare_ffn_params(
        w1_t.astype(jnp.bfloat16), b1.astype(jnp.bfloat16),
        w2_t.astype(jnp.bfloat16), b2.astype(jnp.bfloat16))
    out_bf16 = jax.block_until_ready(ffn_pallas(x.astype(jnp.bfloat16), *params_bf16))
    assert out_bf16.shape == x.shape
    assert jnp.allclose(out_bf16.astype(jnp.float32), ref, atol=5e-2, rtol=5e-2), \
        "bf16 mismatch vs reference"

    # --- Case D: exercise the H-tiled kernel + multi-tile parallel M axis ---
    batch2, seq2, d2, hid2 = 2, 128, 32, 256
    x2 = jax.random.normal(kx2, (batch2, seq2, d2), dtype=jnp.float32)
    w1b, b1b, w2b, b2b = _make_params(kp2, d2, hid2)
    params2 = prepare_ffn_params(w1b, b1b, w2b, b2b)
    ref2 = _reference_ffn(x2, w1b, b1b, w2b, b2b)
    out2 = jax.block_until_ready(
        ffn_pallas(x2, *params2, th=128, weights_resident=False))
    assert out2.shape == x2.shape
    assert jnp.allclose(out2, ref2, atol=1e-4, rtol=1e-4), "H-tiled mismatch vs reference"

    print("KERNEL_OK")
</pallas_src>

<mosaic_0001>
module attributes {stable_mosaic.version = 11 : i64} {
  func.func @_ffn_kernel_fullh(%arg0: i32, %arg1: memref<16x128xf32, #tpu.memory_space<vmem>>, %arg2: memref<128x128xf32, #tpu.memory_space<vmem>>, %arg3: memref<1x128xf32, #tpu.memory_space<vmem>>, %arg4: memref<128x128xf32, #tpu.memory_space<vmem>>, %arg5: memref<1x128xf32, #tpu.memory_space<vmem>>, %arg6: memref<16x128xf32, #tpu.memory_space<vmem>>) attributes {dimension_semantics = [#tpu.dimension_semantics<parallel>], iteration_bounds = array<i64: 1>, scalar_prefetch = 0 : i64, scratch_operands = 0 : i64, tpu.core_type = #tpu.core_type<tc>, window_params = [{transform_indices = @transform_0, window_bounds = array<i64: 16, 128>}, {pipeline_mode = #tpu.pipeline_mode<synchronous>, transform_indices = @transform_1, window_bounds = array<i64: 128, 128>}, {pipeline_mode = #tpu.pipeline_mode<synchronous>, transform_indices = @transform_2, window_bounds = array<i64: 1, 128>}, {pipeline_mode = #tpu.pipeline_mode<synchronous>, transform_indices = @transform_3, window_bounds = array<i64: 128, 128>}, {pipeline_mode = #tpu.pipeline_mode<synchronous>, transform_indices = @transform_4, window_bounds = array<i64: 1, 128>}, {transform_indices = @transform_5, window_bounds = array<i64: 16, 128>}]} {
    %c0 = arith.constant 0 : index
    %c0_0 = arith.constant 0 : index
    %0 = vector.load %arg1[%c0, %c0_0] : memref<16x128xf32, #tpu.memory_space<vmem>>, vector<16x128xf32>
    %c0_1 = arith.constant 0 : index
    %c0_2 = arith.constant 0 : index
    %1 = vector.load %arg2[%c0_1, %c0_2] : memref<128x128xf32, #tpu.memory_space<vmem>>, vector<128x128xf32>
    %cst = arith.constant dense<0.000000e+00> : vector<16x128xf32>
    %2 = tpu.matmul %0, %1, %cst {dimension_numbers = #tpu.dot_dimension_numbers<[1], [0], [0], [1], [0, 0, 1, 1], [], []>} : vector<16x128xf32>, vector<128x128xf32>, vector<16x128xf32> -> vector<16x128xf32>
    %c0_3 = arith.constant 0 : index
    %c0_4 = arith.constant 0 : index
    %3 = vector.load %arg3[%c0_3, %c0_4] : memref<1x128xf32, #tpu.memory_space<vmem>>, vector<1x128xf32>
    %4 = vector.broadcast %3 : vector<1x128xf32> to vector<16x128xf32>
    %5 = arith.addf %2, %4 : vector<16x128xf32>
    %cst_5 = arith.constant 5.000000e-01 : f32
    %6 = vector.broadcast %cst_5 : f32 to vector<16x128xf32>
    %7 = arith.mulf %5, %6 : vector<16x128xf32>
    %cst_6 = arith.constant 0.707106769 : f32
    %8 = vector.broadcast %cst_6 : f32 to vector<16x128xf32>
    %9 = arith.mulf %5, %8 : vector<16x128xf32>
    %10 = math.erf %9 : vector<16x128xf32>
    %cst_7 = arith.constant 1.000000e+00 : f32
    %11 = vector.broadcast %cst_7 : f32 to vector<16x128xf32>
    %12 = arith.addf %11, %10 : vector<16x128xf32>
    %13 = arith.mulf %7, %12 : vector<16x128xf32>
    %c0_8 = arith.constant 0 : index
    %c0_9 = arith.constant 0 : index
    %14 = vector.load %arg4[%c0_8, %c0_9] : memref<128x128xf32, #tpu.memory_space<vmem>>, vector<128x128xf32>
    %cst_10 = arith.constant dense<0.000000e+00> : vector<16x128xf32>
    %15 = tpu.matmul %13, %14, %cst_10 {dimension_numbers = #tpu.dot_dimension_numbers<[1], [0], [0], [1], [0, 0, 1, 1], [], []>} : vector<16x128xf32>, vector<128x128xf32>, vector<16x128xf32> -> vector<16x128xf32>
    %c0_11 = arith.constant 0 : index
    %c0_12 = arith.constant 0 : index
    %16 = vector.load %arg5[%c0_11, %c0_12] : memref<1x128xf32, #tpu.memory_space<vmem>>, vector<1x128xf32>
    %17 = vector.broadcast %16 : vector<1x128xf32> to vector<16x128xf32>
    %18 = arith.addf %15, %17 : vector<16x128xf32>
    %c0_13 = arith.constant 0 : index
    %c0_14 = arith.constant 0 : index
    %19 = vector.load %arg6[%c0_13, %c0_14] : memref<16x128xf32, #tpu.memory_space<vmem>>, vector<16x128xf32>
    tpu.vector_store %arg6[%c0_13, %c0_14], %18 {strides = array<i32>} : memref<16x128xf32, #tpu.memory_space<vmem>>, vector<16x128xf32>,
    return
  }
  func.func @transform_0(%arg0: i32) -> (i32, i32) {
    %c0_i32 = arith.constant 0 : i32
    %c0_i32_0 = arith.constant 0 : i32
    return %arg0, %c0_i32 : i32, i32
  }
  func.func @transform_1(%arg0: i32) -> (i32, i32) {
    %c0_i32 = arith.constant 0 : i32
    %c0_i32_0 = arith.constant 0 : i32
    %c0_i32_1 = arith.constant 0 : i32
    return %c0_i32, %c0_i32_0 : i32, i32
  }
  func.func @transform_2(%arg0: i32) -> (i32, i32) {
    %c0_i32 = arith.constant 0 : i32
    %c0_i32_0 = arith.constant 0 : i32
    %c0_i32_1 = arith.constant 0 : i32
    return %c0_i32, %c0_i32_0 : i32, i32
  }
  func.func @transform_3(%arg0: i32) -> (i32, i32) {
    %c0_i32 = arith.constant 0 : i32
    %c0_i32_0 = arith.constant 0 : i32
    %c0_i32_1 = arith.constant 0 : i32
    return %c0_i32, %c0_i32_0 : i32, i32
  }
  func.func @transform_4(%arg0: i32) -> (i32, i32) {
    %c0_i32 = arith.constant 0 : i32
    %c0_i32_0 = arith.constant 0 : i32
    %c0_i32_1 = arith.constant 0 : i32
    return %c0_i32, %c0_i32_0 : i32, i32
  }
  func.func @transform_5(%arg0: i32) -> (i32, i32) {
    %c0_i32 = arith.constant 0 : i32
    %c0_i32_0 = arith.constant 0 : i32
    return %arg0, %c0_i32 : i32, i32
  }
}

</mosaic_0001>

<bundles_post_ra>
// kernel: ffn_pallas.1
= control target key start
LH: loop header
LB: loop body
LE: loop exit
PB: predicated region body
PF: predicated region fallthrough
CT: control target
= control target key end

     0   :  { %10 = vsyncpa [#allocation3], 0  ;;  %s420_s0 = inlined_call_operand.vmem [shape: f32[16,128], index: 0, kind: input, shape index: {}]   ;;  %s421_s1 = inlined_call_operand.hbm [shape: f32[128,128], index: 1, kind: input, shape index: {}]   ;;  %s422_s2 = inlined_call_operand.vmem [shape: f32[1,128], index: 2, kind: input, shape index: {}]   ;;  %s423_s3 = inlined_call_operand.hbm [shape: f32[128,128], index: 3, kind: input, shape index: {}]   ;;  %s424_s4 = inlined_call_operand.vmem [shape: f32[1,128], index: 4, kind: input, shape index: {}]   ;;  %s425_s5 = inlined_call_operand.vmem [shape: f32[16,128], index: 5, kind: output, shape index: {}]  }
   0x1   :  { %s18_s20 = sshll.u32 %s421_s1, 4  ;;  %s19_s20 = int_to_ptr.hbm [resolvable:$true] %s18_s20 }
   0x2   :  { %11 = vsyncpa [#allocation5], 0  ;;  %s332_s21 = smov [#allocation2]   ;;  %s33_s25 = sshll.u32 %s423_s3, 4  ;;  %s34_s25 = int_to_ptr.hbm [resolvable:$true] %s33_s25 }
   0x3   :  { %s20_s22 = sshll.u32 %s332_s21, 4  ;;  %s333_s26 = smov 128   ;;  %s21_s22 = int_to_ptr.vmem [resolvable:$true] %s20_s22 }
   0x4   :  { %s334_s27 = smov 8   ;;  %s335_s28 = smov [#allocation4]  }
   0x5   :  { %26 = dma.hbm_to_vmem [thread:$0]  %s19_s20, 2048, %s21_s22, [#allocation3], %s333_s26, %s333_s26, %s334_s27  }
   0x6   :  { %s35_s29 = sshll.u32 %s335_s28, 4  ;;  %s36_s29 = int_to_ptr.vmem [resolvable:$true] %s35_s29 }
   0x7   :  { %41 = dma.hbm_to_vmem [thread:$0]  %s34_s25, 2048, %s36_s29, [#allocation5], %s333_s26, %s333_s26, %s334_s27  }
   0x8   :  { %328 = dma.done.wait [#allocation3], 2048  }
   0x9   :  { %329 = vsyncadd [#allocation3], 4294965248 }
   0xa   :  { %330 = dma.done.wait [#allocation5], 2048  }
   0xb   :  { %331 = vsyncadd [#allocation5], 4294965248  ;;  %v69_v0 = vld [vmem:[#allocation2 + $0x78] sm:$0xff]  ;;  %v68_v1 = vld [vmem:[#allocation2 + $0x70] sm:$0xff] }
   0xc   :  { %74 = vmatpush.msra.mxu0 %v69_v0  ;;  %238 = vmatpush.msra.mxu2 %v69_v0  ;;  %v67_v2 = vld [vmem:[#allocation2 + $0x68] sm:$0xff]  ;;  %v66_v3 = vld [vmem:[#allocation2 + $0x60] sm:$0xff]  ;;  %v65_v4 = vld [vmem:[#allocation2 + $0x58] sm:$0xff] }
   0xd   :  { %v64_v5 = vld [vmem:[#allocation2 + $0x50] sm:$0xff]  ;;  %v63_v6 = vld [vmem:[#allocation2 + $0x48] sm:$0xff]  ;;  %v62_v7 = vld [vmem:[#allocation2 + $0x40] sm:$0xff] }
   0xe   :  { %75 = vmatpush.msra.mxu0 %v68_v1  ;;  %239 = vmatpush.msra.mxu2 %v68_v1  ;;  %v61_v8 = vld [vmem:[#allocation2 + $0x38] sm:$0xff]  ;;  %v60_v9 = vld [vmem:[#allocation2 + $0x30] sm:$0xff]  ;;  %v59_v10 = vld [vmem:[#allocation2 + $0x28] sm:$0xff] }
   0xf   :  { %v58_v11 = vld [vmem:[#allocation2 + $0x20] sm:$0xff]  ;;  %v57_v12 = vld [vmem:[#allocation2 + $0x18] sm:$0xff]  ;;  %v56_v13 = vld [vmem:[#allocation2 + $0x10] sm:$0xff] }
  0x10   :  { %76 = vmatpush.msra.mxu0 %v67_v2  ;;  %240 = vmatpush.msra.mxu2 %v67_v2  ;;  %v55_v14 = vld [vmem:[#allocation2 + $0x8] sm:$0xff]  ;;  %v54_v15 = vld [vmem:[#allocation2] sm:$0xff]  ;;  %v200_v18 = vld [vmem:[#allocation4 + $0x78] sm:$0xff] }
  0x11   :  { %v52_v16 = vld [vmem:[%s420_s0] sm:$0xff]  ;;  %v53_v17 = vld [vmem:[%s420_s0 + $0x8] sm:$0xff]  ;;  %205 = vmatpush.msra.mxu1 %v200_v18  ;;  %254 = vmatpush.msra.mxu3 %v200_v18  ;;  %v199_v19 = vld [vmem:[#allocation4 + $0x70] sm:$0xff] }
  0x12   :  { %77 = vmatpush.msra.mxu0 %v66_v3  ;;  %241 = vmatpush.msra.mxu2 %v66_v3  ;;  %v198_v20 = vld [vmem:[#allocation4 + $0x68] sm:$0xff]  ;;  %v197_v21 = vld [vmem:[#allocation4 + $0x60] sm:$0xff]  ;;  %v196_v23 = vld [vmem:[#allocation4 + $0x58] sm:$0xff] }
  0x13   :  { %206 = vmatpush.msra.mxu1 %v199_v19  ;;  %255 = vmatpush.msra.mxu3 %v199_v19  ;;  %v274_v22 = vld [vmem:[%s422_s2] ss:$0 sm:$0xff]  ;;  %v195_v25 = vld [vmem:[#allocation4 + $0x50] sm:$0xff]  ;;  %v194_v27 = vld [vmem:[#allocation4 + $0x48] sm:$0xff] }
  0x14   :  { %78 = vmatpush.msra.mxu0 %v65_v4  ;;  %242 = vmatpush.msra.mxu2 %v65_v4  ;;  %v193_v29 = vld [vmem:[#allocation4 + $0x40] sm:$0xff]  ;;  %v192_v30 = vld [vmem:[#allocation4 + $0x38] sm:$0xff]  ;;  %v191_v33 = vld [vmem:[#allocation4 + $0x30] sm:$0xff] }
  0x15   :  { %207 = vmatpush.msra.mxu1 %v198_v20  ;;  %256 = vmatpush.msra.mxu3 %v198_v20  ;;  %v190_v36 = vld [vmem:[#allocation4 + $0x28] sm:$0xff]  ;;  %v189_v39 = vld [vmem:[#allocation4 + $0x20] sm:$0xff]  ;;  %v188_v43 = vld [vmem:[#allocation4 + $0x18] sm:$0xff] }
  0x16   :  { %79 = vmatpush.msra.mxu0 %v64_v5  ;;  %243 = vmatpush.msra.mxu2 %v64_v5  ;;  %v187_v47 = vld [vmem:[#allocation4 + $0x10] sm:$0xff]  ;;  %v186_v52 = vld [vmem:[#allocation4 + $0x8] sm:$0xff]  ;;  %v185_v56 = vld [vmem:[#allocation4] sm:$0xff] }
  0x17   :  { %208 = vmatpush.msra.mxu1 %v197_v21  ;;  %257 = vmatpush.msra.mxu3 %v197_v21 }
  0x18   :  { %80 = vmatpush.msra.mxu0 %v63_v6  ;;  %244 = vmatpush.msra.mxu2 %v63_v6 }
  0x19   :  { %209 = vmatpush.msra.mxu1 %v196_v23  ;;  %258 = vmatpush.msra.mxu3 %v196_v23 }
  0x1a   :  { %81 = vmatpush.msra.mxu0 %v62_v7  ;;  %245 = vmatpush.msra.mxu2 %v62_v7 }
  0x1b   :  { %210 = vmatpush.msra.mxu1 %v195_v25  ;;  %259 = vmatpush.msra.mxu3 %v195_v25 }
  0x1c   :  { %82 = vmatpush.msra.mxu0 %v61_v8  ;;  %246 = vmatpush.msra.mxu2 %v61_v8 }
  0x1d   :  { %211 = vmatpush.msra.mxu1 %v194_v27  ;;  %260 = vmatpush.msra.mxu3 %v194_v27 }
  0x1e   :  { %83 = vmatpush.msra.mxu0 %v60_v9  ;;  %247 = vmatpush.msra.mxu2 %v60_v9 }
  0x1f   :  { %212 = vmatpush.msra.mxu1 %v193_v29  ;;  %261 = vmatpush.msra.mxu3 %v193_v29 }
  0x20   :  { %84 = vmatpush.msra.mxu0 %v59_v10  ;;  %248 = vmatpush.msra.mxu2 %v59_v10 }
  0x21   :  { %213 = vmatpush.msra.mxu1 %v192_v30  ;;  %262 = vmatpush.msra.mxu3 %v192_v30 }
  0x22   :  { %85 = vmatpush.msra.mxu0 %v58_v11  ;;  %249 = vmatpush.msra.mxu2 %v58_v11 }
  0x23   :  { %214 = vmatpush.msra.mxu1 %v191_v33  ;;  %263 = vmatpush.msra.mxu3 %v191_v33 }
  0x24   :  { %86 = vmatpush.msra.mxu0 %v57_v12  ;;  %250 = vmatpush.msra.mxu2 %v57_v12 }
  0x25   :  { %215 = vmatpush.msra.mxu1 %v190_v36  ;;  %264 = vmatpush.msra.mxu3 %v190_v36 }
  0x26   :  { %87 = vmatpush.msra.mxu0 %v56_v13  ;;  %251 = vmatpush.msra.mxu2 %v56_v13 }
  0x27   :  { %216 = vmatpush.msra.mxu1 %v189_v39  ;;  %265 = vmatpush.msra.mxu3 %v189_v39 }
  0x28   :  { %88 = vmatpush.msra.mxu0 %v55_v14  ;;  %252 = vmatpush.msra.mxu2 %v55_v14 }
  0x29   :  { %217 = vmatpush.msra.mxu1 %v188_v43  ;;  %266 = vmatpush.msra.mxu3 %v188_v43 }
  0x2a   :  { %89 = vmatpush.msra.mxu0 %v54_v15  ;;  %253 = vmatpush.msra.mxu2 %v54_v15 }
  0x2b   :  { %90 = vmatmul.f32.vlgmr.msra.gmra.mxu0 %v52_v16  ;;  %93 = vmatmul.f32.vlgmr.msra.gmra.mxu2 %v53_v17 }
  0x2c   :  { %218 = vmatpush.msra.mxu1 %v187_v47  ;;  %267 = vmatpush.msra.mxu3 %v187_v47 }
  0x2e   :  { %219 = vmatpush.msra.mxu1 %v186_v52  ;;  %268 = vmatpush.msra.mxu3 %v186_v52 }
  0x30   :  { %220 = vmatpush.msra.mxu1 %v185_v56  ;;  %269 = vmatpush.msra.mxu3 %v185_v56  ;;  %v275_v56 = vld [vmem:[%s424_s4] ss:$0 sm:$0xff] }
  0xa8   :  { %v91_v24 = vpop.f32.mrf.mxu0 }
  0xa9   :  { %v381_v26 = vadd.f32 %v274_v22, %v91_v24 }
  0xab   :  { %v384_v28 = vmul.f32 0.70710677, %v381_v26  ;;  %v97_v47 = vmul.f32 0.5, %v381_v26 }
  0xad   :  { %v101_v31 = vmul.f32 %v384_v28, %v384_v28 }
  0xae   :  { %v94_v32 = vpop.f32.mrf.mxu2 }
  0xaf   :  { %v388_v34 = vmin.f32 %v101_v31, 16.0  ;;  %v390_v35 = vadd.f32 %v274_v22, %v94_v32 }
  0xb1   :  { %v103_v37 = vmul.f32 2.1237322e-06, %v388_v34  ;;  %v394_v38 = vmul.f32 0.70710677, %v390_v35  ;;  %v114_v40 = vmul.f32 3.8918573e-05, %v388_v34 }
  0xb3   :  { %v104_v41 = vadd.f32 0.00028619796, %v103_v37  ;;  %v141_v42 = vmul.f32 %v394_v38, %v394_v38  ;;  %v115_v44 = vadd.f32 0.001143296, %v114_v40 }
  0xb5   :  { %v105_v45 = vmul.f32 %v104_v41, %v388_v34  ;;  %v142_v46 = vmin.f32 %v141_v42, 16.0  ;;  %v116_v48 = vmul.f32 %v115_v44, %v388_v34 }
  0xb7   :  { %v143_v49 = vmul.f32 2.1237322e-06, %v142_v46  ;;  %v154_v50 = vmul.f32 3.8918573e-05, %v142_v46  ;;  %v106_v51 = vadd.f32 0.0036580483, %v105_v45 }
  0xb8   :  { %v117_v53 = vadd.f32 0.014752088, %v116_v48 }
  0xb9   :  { %v144_v54 = vadd.f32 0.00028619796, %v143_v49  ;;  %v155_v55 = vadd.f32 0.001143296, %v154_v50  ;;  %v107_v60 = vmul.f32 %v106_v51, %v388_v34 }
  0xba   :  { %v118_v57 = vmul.f32 %v117_v53, %v388_v34  ;;  %v98_v53 = vmul.f32 0.5, %v390_v35 }
  0xbb   :  { %v145_v58 = vmul.f32 %v144_v54, %v142_v46  ;;  %v156_v59 = vmul.f32 %v155_v55, %v142_v46  ;;  %v108_v2 = vadd.f32 0.05243302, %v107_v60 }
  0xbc   :  { %v119_v61 = vadd.f32 0.112945676, %v118_v57 }
  0xbd   :  { %v146_v62 = vadd.f32 0.0036580483, %v145_v58  ;;  %v157_v63 = vadd.f32 0.014752088, %v156_v59  ;;  %v109_v8 = vmul.f32 %v108_v2, %v388_v34 }
  0xbe   :  { %v120_v0 = vmul.f32 %v119_v61, %v388_v34 }
  0xbf   :  { %v158_v1 = vmul.f32 %v157_v63, %v142_v46  ;;  %v147_v4 = vmul.f32 %v146_v62, %v142_v46  ;;  %v110_v13 = vadd.f32 0.18741608, %v109_v8 }
  0xc0   :  { %v121_v3 = vadd.f32 0.4994258, %v120_v0 }
  0xc1   :  { %v159_v5 = vadd.f32 0.112945676, %v158_v1  ;;  %v148_v10 = vadd.f32 0.05243302, %v147_v4  ;;  %v111_v17 = vmul.f32 %v110_v13, %v388_v34 }
  0xc2   :  { %v122_v6 = vmul.f32 %v121_v3, %v388_v34 }
  0xc3   :  { %v160_v7 = vmul.f32 %v159_v5, %v142_v46  ;;  %v149_v14 = vmul.f32 %v148_v10, %v142_v46  ;;  %v112_v21 = vadd.f32 1.1283791, %v111_v17 }
  0xc4   :  { %v123_v9 = vadd.f32 1.0, %v122_v6 }
  0xc5   :  { %v161_v11 = vadd.f32 0.4994258, %v160_v7  ;;  %v150_v18 = vadd.f32 0.18741608, %v149_v14  ;;  %v113_v31 = vmul.f32 %v112_v21, %v384_v28 }
  0xc6   :  { %276 = vrcp.f32 %v123_v9  ;;  %v135_v22 = vand.u32 2147483648, %v123_v9  ;;  %v133_v27 = vand.u32 2147483647, %v123_v9  ;;  %vm129_vm1 = vweird.f32 %v123_v9 }
  0xc7   :  { %v162_v12 = vmul.f32 %v161_v11, %v142_v46  ;;  %v151_v24 = vmul.f32 %v150_v18, %v142_v46 }
  0xc8   :  { %v136_v32 = vor.u32 1.1754944e-38, %v135_v22  ;;  %vm134_vm3 = vcmp.eq.f32.partialorder %v133_v27, 8.507059e+37 }
  0xc9   :  { %v163_v15 = vadd.f32 1.0, %v162_v12  ;;  %v152_v36 = vadd.f32 1.1283791, %v151_v24 }
  0xcb   :  { %278 = vrcp.f32 %v163_v15  ;;  %v175_v37 = vand.u32 2147483648, %v163_v15  ;;  %v173_v41 = vand.u32 2147483647, %v163_v15  ;;  %vm169_vm5 = vweird.f32 %v163_v15 }
  0xcc   :  { %v277_v16 = vpop.eup %276  ;;  %v153_v46 = vmul.f32 %v152_v36, %v394_v38 }
  0xcd   :  { %v125_v19 = vmul.f32 %v277_v16, %v123_v9  ;;  %vm130_vm0 = vweird.f32 %v277_v16  ;;  %v176_v45 = vor.u32 1.1754944e-38, %v175_v37  ;;  %vm174_vm7 = vcmp.eq.f32.partialorder %v173_v41, 8.507059e+37 }
  0xce   :  { %vm131_vm2 = vmor %vm129_vm1, %vm130_vm0 }
  0xcf   :  { %v126_v20 = vsub.f32 1.0, %v125_v19 }
  0xd1   :  { %v279_v23 = vpop.eup %278  ;;  %v127_v25 = vmul.f32 %v277_v16, %v126_v20 }
  0xd2   :  { %v165_v29 = vmul.f32 %v279_v23, %v163_v15  ;;  %vm170_vm4 = vweird.f32 %v279_v23 }
  0xd3   :  { %v128_v30 = vadd.f32 %v277_v16, %v127_v25  ;;  %vm171_vm6 = vmor %vm169_vm5, %vm170_vm4 }
  0xd4   :  { %v166_v33 = vsub.f32 1.0, %v165_v29 }
  0xd5   :  { %v132_v34 = vsel %vm131_vm2, %v277_v16, %v128_v30 }
  0xd6   :  { %v137_v39 = vsel %vm134_vm3, %v136_v32, %v132_v34  ;;  %v167_v40 = vmul.f32 %v279_v23, %v166_v33 }
  0xd7   :  { %v138_v42 = vmul.f32 %v137_v39, %v113_v31 }
  0xd8   :  { %v168_v43 = vadd.f32 %v279_v23, %v167_v40 }
  0xd9   :  { %v236_v44 = vclamps-f32 %v138_v42, 1.0 }
  0xda   :  { %v172_v28 = vsel %vm171_vm6, %v279_v23, %v168_v43 }
  0xdb   :  { %v181_v48 = vadd.f32 1.0, %v236_v44  ;;  %v177_v49 = vsel %vm174_vm7, %v176_v45, %v172_v28 }
  0xdc   :  { %v178_v50 = vmul.f32 %v177_v49, %v153_v46 }
  0xdd   :  { %v183_v51 = vmul.f32 %v181_v48, %v97_v47 }
  0xde   :  { %v237_v52 = vclamps-f32 %v178_v50, 1.0 }
  0xdf   :  { %221 = vmatmul.f32.vlgmr.msra.gmra.mxu1 %v183_v51 }
  0xe0   :  { %v182_v54 = vadd.f32 1.0, %v237_v52 }
  0xe2   :  { %v184_v55 = vmul.f32 %v182_v54, %v98_v53 }
  0xe4   :  { %224 = vmatmul.f32.vlgmr.msra.gmra.mxu3 %v184_v55 }
 0x15c   :  { %v222_v38 = vpop.f32.mrf.mxu1 }
 0x15d   :  { %v223_v57 = vadd.f32 %v275_v56, %v222_v38 }
 0x15f   :  { %228 = vst [vmem:[%s425_s5] sm:$0xff] %v223_v57 }
 0x167   :  { %v225_v26 = vpop.f32.mrf.mxu3 }
 0x168   :  { %v226_v58 = vadd.f32 %v275_v56, %v225_v26 }
 0x16a   :  { %229 = vst [vmem:[%s425_s5 + $0x8] sm:$0xff] %v226_v58 }
 0x16b   :  { %234 = vsyncpa [#allocation3], 1 }
 0x16c   :  { %235 = vsyncpa [#allocation5], 1 }

</bundles_post_ra>
